<compile_context>
chip_gen: v7x
topology: tpu7x:2x2x1
jax: 0.10.0
libtpu: 0.0.40
codegen_flags: <defaults>
</compile_context>

<pallas_src>
import jax
import jax.numpy as jnp
from jax.experimental import pallas as pl
from jax.experimental.pallas import tpu as pltpu

# ---- toy config consistent with the module ----
B = 2            # batch
C = 32           # config.hidden_size
NUM_LABELS = 2   # config.num_labels


def sop_head_kernel(x_ref, w_ref, b_ref, out_ref):
    # Dropout(classifier_dropout_prob) is an inference no-op.
    # Single fused MXU matmul with f32 accumulation + bias add.
    logits = jnp.dot(x_ref[...], w_ref[...], preferred_element_type=jnp.float32)
    out_ref[...] = (logits + b_ref[...]).astype(out_ref.dtype)


def prepare_sop_head_params(weight, bias):
    """One-time parameter prep (hoisted out of the per-call path).

    weight: (C, NUM_LABELS)  -- already (in_features, out_features) layout,
            i.e. the transpose of torch's nn.Linear (out, in) weight.
    bias:   (NUM_LABELS,)
    """
    # NOTE: on v5e/v6e one could additionally pre-cast the weight to bf16
    # (keeping preferred_element_type=f32); kept f32 here since the kernel is
    # fixed-overhead-bound and f32 matches the reference bit-for-bit.
    w = jnp.asarray(weight, jnp.float32)                      # (C, L)
    b = jnp.asarray(bias, jnp.float32).reshape(1, -1)         # (1, L)
    return w, b


@jax.jit
def convbert_sop_head(pooled_output, w, b):
    """pooled_output: [B, C]; w: [C, L] (pre-transposed); b: [1, L]."""
    bsz, hidden = pooled_output.shape
    labels = w.shape[1]

    vmem = pl.BlockSpec(memory_space=pltpu.MemorySpace.VMEM)
    cost = pl.CostEstimate(
        flops=2 * bsz * hidden * labels,
        bytes_accessed=4 * (bsz * hidden + hidden * labels + labels + bsz * labels),
        transcendentals=0,
    )

    return pl.pallas_call(
        sop_head_kernel,
        out_shape=jax.ShapeDtypeStruct((bsz, labels), jnp.float32),
        in_specs=[vmem, vmem, vmem],
        out_specs=vmem,
        cost_estimate=cost,
    )(pooled_output.astype(jnp.float32), w, b)


def reference(pooled_output, weight, bias):
    return pooled_output @ weight + bias


if __name__ == "__main__":
    key = jax.random.PRNGKey(0)
    k_x, k_w, k_b = jax.random.split(key, 3)

    pooled_output = jax.random.normal(k_x, (B, C), jnp.float32)
    weight = (0.02 * jax.random.normal(k_w, (C, NUM_LABELS))).astype(jnp.float32)
    bias = (0.02 * jax.random.normal(k_b, (NUM_LABELS,))).astype(jnp.float32)

    # Parameter prep happens once (model-load time), not per forward call.
    w, b = prepare_sop_head_params(weight, bias)

    logits = convbert_sop_head(pooled_output, w, b)
    logits = jax.block_until_ready(logits)

    ref = reference(pooled_output, weight, bias)
    assert logits.shape == (B, NUM_LABELS)
    assert jnp.allclose(logits, ref, atol=1e-5, rtol=1e-5), \
        "mismatch vs pure-JAX reference"

    print("KERNEL_OK")
</pallas_src>

<mosaic_0001>
module attributes {stable_mosaic.version = 11 : i64} {
  func.func @sop_head_kernel(%arg0: memref<2x32xf32, #tpu.memory_space<vmem>>, %arg1: memref<32x2xf32, #tpu.memory_space<vmem>>, %arg2: memref<1x2xf32, #tpu.memory_space<vmem>>, %arg3: memref<2x2xf32, #tpu.memory_space<vmem>>) attributes {dimension_semantics = [], scalar_prefetch = 0 : i64, scratch_operands = 0 : i64, tpu.core_type = #tpu.core_type<tc>} {
    %c0 = arith.constant 0 : index
    %c0_0 = arith.constant 0 : index
    %0 = vector.load %arg0[%c0, %c0_0] : memref<2x32xf32, #tpu.memory_space<vmem>>, vector<2x32xf32>
    %c0_1 = arith.constant 0 : index
    %c0_2 = arith.constant 0 : index
    %1 = vector.load %arg1[%c0_1, %c0_2] : memref<32x2xf32, #tpu.memory_space<vmem>>, vector<32x2xf32>
    %cst = arith.constant dense<0.000000e+00> : vector<2x2xf32>
    %2 = tpu.matmul %0, %1, %cst {dimension_numbers = #tpu.dot_dimension_numbers<[1], [0], [0], [1], [0, 0, 1, 1], [], []>} : vector<2x32xf32>, vector<32x2xf32>, vector<2x2xf32> -> vector<2x2xf32>
    %c0_3 = arith.constant 0 : index
    %c0_4 = arith.constant 0 : index
    %3 = vector.load %arg2[%c0_3, %c0_4] : memref<1x2xf32, #tpu.memory_space<vmem>>, vector<1x2xf32>
    %4 = vector.broadcast %3 : vector<1x2xf32> to vector<2x2xf32>
    %5 = arith.addf %2, %4 : vector<2x2xf32>
    %c0_5 = arith.constant 0 : index
    %c0_6 = arith.constant 0 : index
    %6 = vector.load %arg3[%c0_5, %c0_6] : memref<2x2xf32, #tpu.memory_space<vmem>>, vector<2x2xf32>
    tpu.vector_store %arg3[%c0_5, %c0_6], %5 {strides = array<i32>} : memref<2x2xf32, #tpu.memory_space<vmem>>, vector<2x2xf32>,
    return
  }
}

</mosaic_0001>

<bundles_post_ra>
// kernel: convbert_sop_head.1
= control target key start
LH: loop header
LB: loop body
LE: loop exit
PB: predicated region body
PF: predicated region fallthrough
CT: control target
= control target key end

     0   :  { %v169_v3 = vmov 0.0|0.0   ;;  %vm170_vm0 = vmmov 0   ;;  %v171_v6 = vmov 0.0   ;;  %s223_s0 = inlined_call_operand.vmem [shape: f32[2,32], index: 0, kind: input, shape index: {}]   ;;  %s224_s1 = inlined_call_operand.vmem [shape: f32[32,2], index: 1, kind: input, shape index: {}]   ;;  %s225_s2 = inlined_call_operand.vmem [shape: f32[1,2], index: 2, kind: input, shape index: {}]   ;;  %s226_s3 = inlined_call_operand.hbm [shape: f32[2,2], index: 3, kind: output, shape index: {}]  }
   0x1   :  { %v16_v0 = vld [vmem:[%s224_s1] sm:$0xff]  ;;  %v17_v1 = vld [vmem:[%s224_s1 + $0x8] sm:$0xff]  ;;  %v18_v2 = vld [vmem:[%s224_s1 + $0x10] sm:$0xff]  ;;  %135 = vmatprep.subr.bf16.mxu0 %v169_v3  ;;  %132 = vmatprep.mubr.msk.f32.mxu0 %vm170_vm0, %v171_v6 }
   0x2   :  { %v136_v4 = vpack.c.bf16 %v17_v1, %v16_v0  ;;  %v19_v5 = vld [vmem:[%s224_s1 + $0x18] sm:$0xff] }
   0x3   :  { %8 = vsyncpa [#allocation3], 0  ;;  %v139_v7 = vpack.c.bf16 %v19_v5, %v18_v2  ;;  %v15_v8 = vld [vmem:[%s223_s0] sm:$0x3]  ;;  %vm27_vm1 = vcmask 261120   ;;  %s172_s24 = smov [#allocation2]  }
   0x4   :  { %137 = vmatpush3.bf16.msra.mxu0 %v136_v4  ;;  %v117_v9 = vld [vmem:[%s225_s2] ss:$0 sm:$0xff]  ;;  %s109_s1 = sshll.u32 %s172_s24, 4  ;;  %vm101_vm2 = vcmask 9216   ;;  %s110_s1 = int_to_ptr.vmem [resolvable:$true] %s109_s1 }
   0x5   :  { %138 = vmatprep.subr.bf16.mxu0 %v169_v3  ;;  %s145_s25 = scalar_lea.vmem %s110_s1, 32  ;;  %p150_p1 = scmp.lt.s32.totalorder %s110_s1, %s110_s1 }
   0x6   :  { %p146_p0 = scmp.ne.s32.totalorder %s110_s1, %s145_s25  ;;  %p151_p2 = scmp.lt.s32.totalorder %s145_s25, %s145_s25 }
   0x8   :  { %140 = vmatpush3.bf16.msra.mxu0 %v139_v7  ;;  %p152_p3 = por %p151_p2, %p150_p1 }
   0xa   :  { %p153_p4 = pnand %p152_p3, %p146_p0 }
   0xb   :  { %133 = vmatmul.mubr.msk.f32.vlgmr.msra.gmra.mrb[0].mxu0 %vm27_vm1, %v15_v8 }
  0xde   :  { %v97_v10 = vpop.f32.mrb[0].mxu0 }
  0xdf   :  { %v98_v11 = vadd.f32 %v117_v9, %v97_v10  ;;  %v134_v12 = vpop.f32.mrb[1].mxu0 }
  0xe1   :  { %102 = vst.msk [vmem:[#allocation2] sm:$0x3] %vm101_vm2, %v98_v11 }
  0xe2   :  { %156 = shalt.err (!%p153_p4)
}
  0xe3   :  { %s157_s27 = scalar_lea.hbm %s226_s3, 32 }
  0xe4   :  { %p158_p5 = scmp.ne.s32.totalorder %s226_s3, %s157_s27  ;;  %p161_p6 = scmp.lt.u32.totalorder %s157_s27, %s226_s3 }
  0xe6   :  { %p163_p7 = pnand %p161_p6, %p158_p5 }
  0xe8   :  { %166 = shalt.err (!%p163_p7)
}
  0xe9   :  { %112 = dma.vmem_to_hbm [thread:$0]  %s110_s1, 32, %s226_s3, [#allocation3]  }
  0xea   :  { %167 = dma.done.wait [#allocation3], 32  }
  0xeb   :  { %168 = vsyncadd [#allocation3], 4294967264 }
  0xec   :  { %116 = vsyncpa [#allocation3], 1 }

</bundles_post_ra>
